<compile_context>
chip_gen: v6e
topology: v6e:2x2x1
jax: 0.10.0
libtpu: 0.0.40
codegen_flags: <defaults>
</compile_context>

<pallas_src>
import jax
import jax.numpy as jnp
from jax.experimental import pallas as pl
from jax.experimental.pallas import tpu as pltpu


# ----------------------------- kernels --------------------------------------


def _focus_conv_kernel_exact(x_ref, w_ref, b_ref, o_ref):
    """o = SiLU(W @ x + b), exact f32 epilogue (safe on v5e/v6e/v7x).

    x_ref: (K, TM)      space-to-depth activations (channel-major, spatial on lanes)
    w_ref: (C_out, K)   BN-scale-folded 1x1 conv weight (VMEM-resident)
    b_ref: (C_out, 1)   folded BN bias, f32
    o_ref: (C_out, TM)  output tile (lane dim = spatial -> lane-dense stores)
    """
    y = jnp.dot(w_ref[...], x_ref[...], preferred_element_type=jnp.float32)
    y = y + b_ref[...]                                   # (C_out,1) broadcast, f32
    o_ref[...] = (y / (1.0 + jnp.exp(-y))).astype(o_ref.dtype)   # SiLU = y*sigmoid(y)


def _focus_conv_kernel_fast(x_ref, w_ref, b_ref, o_ref):
    """Same as above, but the sigmoid denominator uses the EUP approx reciprocal
    (recommended on v6e/v7x once the kernel is otherwise HBM-limited)."""
    y = jnp.dot(w_ref[...], x_ref[...], preferred_element_type=jnp.float32)
    y = y + b_ref[...]
    sig = pl.reciprocal(1.0 + jnp.exp(-y), approx=True)
    o_ref[...] = (y * sig).astype(o_ref.dtype)


# ----------------------------- tiling helper --------------------------------


def _choose_tm(m, batch, k, c_out, in_itemsize, out_itemsize,
               target=8192, vmem_budget=40 << 20):
    """Spatial (lane) tile width.

    - full extent if M < 128, else a multiple of 128 (unmasked lane-dense stores);
    - as large as `target` allows, shrunk only if the double-buffered tile footprint
      would exceed `vmem_budget` (a few MiB for realistic Focus shapes, so this
      rarely triggers -- and stays far under even v7x's 64 MiB VMEM);
    - shrunk further if the grid would otherwise have < 2 steps (v7x megacore).
    """
    if m <= 128:
        return m
    tm = min(m, max(128, (target // 128) * 128))
    tm = (tm // 128) * 128

    def footprint(t):
        return (2 * t * k * in_itemsize          # double-buffered activation tile
                + 2 * t * c_out * out_itemsize   # double-buffered output tile
                + t * c_out * 4)                 # f32 matmul / SiLU intermediate

    while tm > 128 and footprint(tm) > vmem_budget:
        tm = max(128, (tm // 2 // 128) * 128)
    while tm > 128 and batch * ((m + tm - 1) // tm) < 2:
        tm = max(128, (tm // 2 // 128) * 128)
    return tm


# ----------------------------- forward --------------------------------------


def focus_v2_forward(x, conv2_weight, bn_gamma, bn_beta, bn_mean, bn_var,
                     eps=1e-5, compute_dtype=None, tm_target=8192,
                     fast_epilogue=False):
    """FocusV2 forward (eval-mode BN).

    x:            (B, C, H, W)   NCHW, H and W even
    conv2_weight: (C_out, 4*C)   1x1 conv weight (kernel dims squeezed), bias=False.
                  K order is [TL, BL, TR, BR], matching the PyTorch FocusV2 conv1
                  weight construction (i->(0,0), i+C->(1,0), i+2C->(0,1), i+3C->(1,1)).
    bn_*:         (C_out,)       BatchNorm2d params / running stats
    fast_epilogue: use EUP approx reciprocal in the SiLU (v6e/v7x); keep False on v5e.
    returns:      (B, C_out, H//2, W//2) NCHW, dtype of x
    """
    B, C, H, W = x.shape
    assert H % 2 == 0 and W % 2 == 0, (H, W)
    C_out = conv2_weight.shape[0]
    H2, W2 = H // 2, W // 2
    K = 4 * C
    M = H2 * W2

    if compute_dtype is None:
        compute_dtype = x.dtype      # bf16 in -> bf16 matmul path; f32 stays f32

    # --- conv1: fixed 2x2/stride-2 space-to-depth, channel order [TL, BL, TR, BR].
    #     Cast FIRST so the single materialized intermediate is in compute_dtype.
    #     Stays NCHW; the flatten to (B, K, M) is a pure reshape.
    xc = x.astype(compute_dtype)
    tl = xc[:, :, 0::2, 0::2]
    bl = xc[:, :, 1::2, 0::2]
    tr = xc[:, :, 0::2, 1::2]
    br = xc[:, :, 1::2, 1::2]
    x_s2d = jnp.concatenate([tl, bl, tr, br], axis=1)            # (B, 4C, H2, W2)
    x_flat = x_s2d.reshape(B, K, M)                              # (B, K, M)

    # --- Fold eval-mode BatchNorm: scale into the weight (f32, then cast), bias in f32.
    scale = (bn_gamma.astype(jnp.float32)
             / jnp.sqrt(bn_var.astype(jnp.float32) + eps))       # (C_out,)
    bias = bn_beta.astype(jnp.float32) - bn_mean.astype(jnp.float32) * scale
    w_mat = conv2_weight.reshape(C_out, K).astype(jnp.float32)
    w_scaled = (w_mat * scale[:, None]).astype(compute_dtype)    # (C_out, K)
    bias2 = bias.reshape(C_out, 1)                               # (C_out, 1) f32

    in_itemsize = jnp.dtype(compute_dtype).itemsize
    out_itemsize = jnp.dtype(x.dtype).itemsize

    TM = _choose_tm(M, B, K, C_out, in_itemsize, out_itemsize, target=tm_target)
    grid = (B, pl.cdiv(M, TM))

    # VMEM limit = actual double-buffered footprint + headroom (no artificial cap).
    tile_bytes = (2 * TM * K * in_itemsize
                  + 2 * TM * C_out * out_itemsize
                  + TM * C_out * 4
                  + C_out * K * in_itemsize + C_out * 4)
    vmem_limit = int(max(tile_bytes + (4 << 20), 8 << 20))

    cost = pl.CostEstimate(
        flops=2 * B * M * K * C_out,
        transcendentals=B * M * C_out,                 # sigmoid exp
        bytes_accessed=(B * M * K * in_itemsize
                        + C_out * K * in_itemsize
                        + B * M * C_out * out_itemsize),
    )

    kernel = _focus_conv_kernel_fast if fast_epilogue else _focus_conv_kernel_exact

    # NOTE: if profiling ever shows the activation DMA exposed at small K, add
    # pipeline_mode=pl.Buffered(3) to the activation BlockSpec below.
    out_flat = pl.pallas_call(
        kernel,
        out_shape=jax.ShapeDtypeStruct((B, C_out, M), x.dtype),
        grid=grid,
        in_specs=[
            # activation tile: batch squeezed, all K rows, TM spatial columns
            pl.BlockSpec((None, K, TM), lambda b, m: (b, 0, m)),
            # weight / bias: constant block index -> resident in VMEM across the grid
            pl.BlockSpec((C_out, K), lambda b, m: (0, 0)),
            pl.BlockSpec((C_out, 1), lambda b, m: (0, 0)),
        ],
        out_specs=pl.BlockSpec((None, C_out, TM), lambda b, m: (b, 0, m)),
        compiler_params=pltpu.CompilerParams(
            dimension_semantics=("parallel", "parallel"),
            vmem_limit_bytes=vmem_limit,
        ),
        cost_estimate=cost,
    )(x_flat, w_scaled, bias2)

    # Already channel-major: a pure reshape gives NCHW (no transpose).
    return out_flat.reshape(B, C_out, H2, W2)


# ----------------------------- reference ------------------------------------


def _reference_forward(x, conv2_weight, bn_gamma, bn_beta, bn_mean, bn_var, eps=1e-5):
    """Pure-JAX reference mirroring the PyTorch module (eval mode)."""
    tl = x[:, :, 0::2, 0::2]
    bl = x[:, :, 1::2, 0::2]
    tr = x[:, :, 0::2, 1::2]
    br = x[:, :, 1::2, 1::2]
    x_s2d = jnp.concatenate([tl, bl, tr, br], axis=1)            # (B, 4C, H2, W2)
    y = jnp.einsum('bkhw,ok->bohw', x_s2d, conv2_weight.reshape(conv2_weight.shape[0], -1))
    scale = bn_gamma / jnp.sqrt(bn_var + eps)
    bias = bn_beta - bn_mean * scale
    y = y * scale[None, :, None, None] + bias[None, :, None, None]
    return y * jax.nn.sigmoid(y)


if __name__ == "__main__":
    # Small shapes consistent with the module: FocusV2(in_channels=4, out_channels=8).
    B, C, H, W = 2, 4, 16, 16
    C_out = 8

    key = jax.random.PRNGKey(0)
    kx, kw = jax.random.split(key)
    x = jax.random.normal(kx, (B, C, H, W), dtype=jnp.float32)

    # Deterministic synthetic parameters (conv2 is 1x1, bias=False; BN in eval mode).
    conv2_weight = jax.random.normal(kw, (C_out, 4 * C), dtype=jnp.float32) * 0.1
    bn_gamma = 1.0 + 0.05 * jnp.arange(C_out, dtype=jnp.float32)
    bn_beta = 0.02 * jnp.arange(C_out, dtype=jnp.float32)
    bn_mean = 0.01 * jnp.arange(C_out, dtype=jnp.float32)
    bn_var = 1.0 + 0.1 * jnp.arange(C_out, dtype=jnp.float32)

    ref = _reference_forward(x, conv2_weight, bn_gamma, bn_beta, bn_mean, bn_var)

    # Exact epilogue (default): tight tolerance.
    out = focus_v2_forward(x, conv2_weight, bn_gamma, bn_beta, bn_mean, bn_var)
    out = jax.block_until_ready(out)
    assert out.shape == (B, C_out, H // 2, W // 2), out.shape
    max_err = float(jnp.max(jnp.abs(out - ref)))
    assert jnp.allclose(out, ref, atol=2e-5, rtol=2e-5), max_err

    # Fast (EUP-approx) epilogue path for v6e/v7x: loose tolerance.
    out_fast = focus_v2_forward(x, conv2_weight, bn_gamma, bn_beta, bn_mean, bn_var,
                                fast_epilogue=True)
    out_fast = jax.block_until_ready(out_fast)
    max_err_fast = float(jnp.max(jnp.abs(out_fast - ref)))
    assert jnp.allclose(out_fast, ref, atol=5e-2, rtol=5e-2), max_err_fast

    print("KERNEL_OK")
</pallas_src>

<mosaic_0001>
module attributes {stable_mosaic.version = 11 : i64} {
  func.func @_focus_conv_kernel_exact(%arg0: i32, %arg1: i32, %arg2: memref<1x16x64xf32, #tpu.memory_space<vmem>>, %arg3: memref<8x16xf32, #tpu.memory_space<vmem>>, %arg4: memref<8x1xf32, #tpu.memory_space<vmem>>, %arg5: memref<1x8x64xf32, #tpu.memory_space<vmem>>) attributes {dimension_semantics = [#tpu.dimension_semantics<parallel>, #tpu.dimension_semantics<parallel>], iteration_bounds = array<i64: 2, 1>, scalar_prefetch = 0 : i64, scratch_operands = 0 : i64, tpu.core_type = #tpu.core_type<tc>, window_params = [{transform_indices = @transform_0, window_bounds = array<i64: 1, 16, 64>}, {pipeline_mode = #tpu.pipeline_mode<synchronous>, transform_indices = @transform_1, window_bounds = array<i64: 8, 16>}, {pipeline_mode = #tpu.pipeline_mode<synchronous>, transform_indices = @transform_2, window_bounds = array<i64: 8, 1>}, {transform_indices = @transform_3, window_bounds = array<i64: 1, 8, 64>}]} {
    %c0 = arith.constant 0 : index
    %c0_0 = arith.constant 0 : index
    %0 = vector.load %arg3[%c0, %c0_0] : memref<8x16xf32, #tpu.memory_space<vmem>>, vector<8x16xf32>
    %c0_1 = arith.constant 0 : index
    %c0_2 = arith.constant 0 : index
    %c0_3 = arith.constant 0 : index
    %1 = vector.load %arg2[%c0_1, %c0_2, %c0_3] : memref<1x16x64xf32, #tpu.memory_space<vmem>>, vector<1x16x64xf32>
    %2 = vector.shape_cast %1 : vector<1x16x64xf32> to vector<16x64xf32>
    %cst = arith.constant dense<0.000000e+00> : vector<8x64xf32>
    %3 = tpu.matmul %0, %2, %cst {dimension_numbers = #tpu.dot_dimension_numbers<[1], [0], [0], [1], [0, 0, 1, 1], [], []>} : vector<8x16xf32>, vector<16x64xf32>, vector<8x64xf32> -> vector<8x64xf32>
    %c0_4 = arith.constant 0 : index
    %c0_5 = arith.constant 0 : index
    %4 = vector.load %arg4[%c0_4, %c0_5] : memref<8x1xf32, #tpu.memory_space<vmem>>, vector<8x1xf32>
    %5 = vector.broadcast %4 : vector<8x1xf32> to vector<8x64xf32>
    %6 = arith.addf %3, %5 : vector<8x64xf32>
    %cst_6 = arith.constant 0.000000e+00 : f32
    %7 = vector.broadcast %cst_6 : f32 to vector<8x64xf32>
    %8 = arith.subf %7, %6 : vector<8x64xf32>
    %9 = math.exp %8 : vector<8x64xf32>
    %cst_7 = arith.constant 1.000000e+00 : f32
    %10 = vector.broadcast %cst_7 : f32 to vector<8x64xf32>
    %11 = arith.addf %10, %9 : vector<8x64xf32>
    %12 = arith.divf %6, %11 : vector<8x64xf32>
    %c0_8 = arith.constant 0 : index
    %c0_9 = arith.constant 0 : index
    %c0_10 = arith.constant 0 : index
    %13 = vector.load %arg5[%c0_8, %c0_9, %c0_10] : memref<1x8x64xf32, #tpu.memory_space<vmem>>, vector<1x8x64xf32>
    %14 = vector.shape_cast %13 : vector<1x8x64xf32> to vector<8x64xf32>
    %15 = vector.shape_cast %12 : vector<8x64xf32> to vector<1x8x64xf32>
    tpu.vector_store %arg5[%c0_8, %c0_9, %c0_10], %15 {strides = array<i32>} : memref<1x8x64xf32, #tpu.memory_space<vmem>>, vector<1x8x64xf32>,
    return
  }
  func.func @transform_0(%arg0: i32, %arg1: i32) -> (i32, i32, i32) {
    %c0_i32 = arith.constant 0 : i32
    %c0_i32_0 = arith.constant 0 : i32
    return %arg0, %c0_i32, %arg1 : i32, i32, i32
  }
  func.func @transform_1(%arg0: i32, %arg1: i32) -> (i32, i32) {
    %c0_i32 = arith.constant 0 : i32
    %c0_i32_0 = arith.constant 0 : i32
    %c0_i32_1 = arith.constant 0 : i32
    return %c0_i32, %c0_i32_0 : i32, i32
  }
  func.func @transform_2(%arg0: i32, %arg1: i32) -> (i32, i32) {
    %c0_i32 = arith.constant 0 : i32
    %c0_i32_0 = arith.constant 0 : i32
    %c0_i32_1 = arith.constant 0 : i32
    return %c0_i32, %c0_i32_0 : i32, i32
  }
  func.func @transform_3(%arg0: i32, %arg1: i32) -> (i32, i32, i32) {
    %c0_i32 = arith.constant 0 : i32
    %c0_i32_0 = arith.constant 0 : i32
    return %arg0, %c0_i32, %arg1 : i32, i32, i32
  }
}

</mosaic_0001>

<bundles_post_ra>
// kernel: tpu_custom_call.1
= control target key start
LH: loop header
LB: loop body
LE: loop exit
PB: predicated region body
PF: predicated region fallthrough
CT: control target
= control target key end

     0   :  { %8 = vsyncpa [#allocation3], 0  ;;  %s767_s0 = inlined_call_operand.hbm [shape: f32[2,16,64], index: 0, kind: input, shape index: {}]   ;;  %s768_s1 = inlined_call_operand.vmem [shape: f32[8,16], index: 1, kind: input, shape index: {}]   ;;  %s769_s2 = inlined_call_operand.vmem [shape: f32[8,1], index: 2, kind: input, shape index: {}]   ;;  %s770_s3 = inlined_call_operand.hbm [shape: f32[2,8,64], index: 3, kind: output, shape index: {}]  }
   0x1   :  { %10 = vsyncpa [#allocation3 + $0x1], 0 }
   0x2   :  { %11 = vsyncpa [#allocation4], 0 }
   0x3   :  { %13 = vsyncpa [#allocation4 + $0x1], 0  ;;  %s628_s12 = smov 0   ;;  %s630_s13 = smov 0  }
   0x4   :  { %s632_s14 = smov 0   ;;  %s634_s15 = smov 0  }
   0x5   :  { %s636_s16 = smov 0   ;;  %s638_s17 = smov 0  }
   0x6 LB: > { %s393_s18 = sadd.s32 4294967295, %s599_s17   ;;  %s394_s19 = sadd.s32 4294967294, %s599_s17   ;;  %s599_s17 = sphi %s638_s17, %s19_s17   ;;  %s595_s16 = sphi %s636_s16, %s781_s16   ;;  %s591_s15 = sphi %s634_s15, %s780_s15   ;;  %s587_s14 = sphi %s632_s14, %s779_s14   ;;  %s583_s13 = sphi %s630_s13, %s778_s13   ;;  %s579_s12 = sphi %s628_s12, %s777_s12  }
   0x7   : > { %s31_s20 = sadd.s32 1, %s595_s16  ;;  %s40_s21 = sadd.s32 1, %s587_s14 }
   0x8   : > { %p33_p0 = scmp.ge.s32.totalorder %s31_s20, 2  ;;  %p47_p1 = scmp.ne.s32.totalorder %s587_s14, %s583_s13 }
   0x9   : > { %p48_p2 = scmp.eq.s32.totalorder %s599_s17, 0  ;;  %p53_p3 = scmp.ne.s32.totalorder %s583_s13, %s579_s12 }
   0xa   : > { %s783_s20 = smov (%p33_p0, %s31_s20), 0  ;;  %p54_p5 = scmp.eq.s32.totalorder %s393_s18, 0 }
   0xb   : > { %p669_p4 = por %p48_p2, %p47_p1  ;;  %s35_s23 = ssub.s32 %s595_s16, %s783_s20 }
   0xc   : > { %p121_p6 = scmp.eq.s32.totalorder %s393_s18, 1  ;;  %p38_p7 = scmp.eq.s32.totalorder %s35_s23, 0 }
   0xd   : > { %p675_p8 = por %p54_p5, %p53_p3  ;;  %p127_p10 = scmp.eq.s32.totalorder %s394_s19, 1 }
   0xe   : > { %p679_p9 = por %p121_p6, %p47_p1  ;;  %p431_p13 = scmp.lt.s32.totalorder %s599_s17, 2 }
   0xf   : > { %s684_s26 = scalar_select %p38_p7, %s587_s14, %s40_s21  }
  0x10   : > { %p686_p11 = por %p127_p10, %p53_p3  ;;  %s153_s28 = sand.u32 1, %s587_s14  }
  0x11   : > { %s397_s29 = sshll.u32 %s153_s28, 4  ;;  %s408_s30 = sshll.u32 %s595_s16, 8 }
  0x12   : > { %s164_s6 = scalar_lea.hbm %s767_s0, %s408_s30  ;;  %s157_s7 = scalar_lea.vmem [#allocation2], %s397_s29 }
  0x13   : > { %s165_s8 = sshll.u32 %s157_s7, 4  ;;  %p699_p0 = pnand %p431_p13, %p669_p4  ;;  %s166_s8 = int_to_ptr.vmem [resolvable:$true] %s165_s8 }
  0x14   : > { %p400_p1 = scmp.ge.s32.totalorder %s599_s17, 1  ;;  %s154_s10 = scalar_lea.sflag [#allocation3], %s153_s28 }
  0x15   : > { %p493_p2 = pneg %p699_p0  ;;  %s504_s11 = scalar_lea.vmem %s166_s8, 256 }
  0x16   : > { %p505_p3 = scmp.ne.s32.totalorder %s166_s8, %s504_s11  ;;  %s601_s18 = smov [#allocation2]  }
  0x17   : > { %s509_s19 = sshll.u32 %s601_s18, 4  ;;  %s510_s19 = int_to_ptr.vmem [resolvable:$false] %s509_s19 }
  0x18   : > { %p507_p5 = pnand %p505_p3, %p493_p2  ;;  %s511_s21 = scalar_lea.vmem %s510_s19, 512 }
  0x19   : > { %p512_p7 = scmp.lt.s32.totalorder %s166_s8, %s510_s19  ;;  %p513_p10 = scmp.lt.s32.totalorder %s511_s21, %s504_s11 }
  0x1a   : > { %p508_p6 = pneg %p507_p5 }
  0x1b   : > { %p514_p12 = por %p513_p10, %p512_p7 }
  0x1d   : > { %p515_p4 = pnand %p514_p12, %p508_p6 }
  0x1f   : > { %518 = shalt.err (!%p515_p4)
}
  0x20   : > { %s602_s22 = smov 128   ;;  %s603_s23 = smov 8  }
  0x21   : > { %426 = dma.hbm_to_vmem [thread:$0]  (!%p699_p0), %s164_s6, 256, %s166_s8, %s154_s10, %s602_s22, %s602_s22, %s603_s23  }
  0x22   : > { %p173_p13 = scmp.lt.s32.totalorder %s599_s17, 3 }
  0x24   : > { %p174_p2 = pnand %p400_p1, %p173_p13 }
  0x25   : > { %s712_s28 = sand.u32 (!%p174_p2), 1, %s583_s13  }
  0x26   : > { %177 = sbr.rel (%p174_p2) target bundleno = 293 (0x125), region = 32  ;;  %s401_s29 = sshll.u32 (!%p174_p2), %s712_s28, 4 }
  0x27   : > { %s180_s30 = scalar_lea.sflag (!%p174_p2), [#allocation3], %s712_s28  ;;  %s183_s4 = scalar_lea.vmem (!%p174_p2), [#allocation2], %s401_s29 }
  0x2b   : > { %570 = dma.done.wait (%p675_p8), %s180_s30, 256  }
  0x2c   : > { %572 = vsyncadd (%p675_p8), %s180_s30, 4294967040  ;;  %v604_v0 = vmov 0.0   ;;  %vm605_vm0 = vmmov 0   ;;  %v606_v1 = vmov 0   ;;  %v208_v2 = vld [vmem:[%s183_s4 + $0x8] sm:$0xff]  ;;  %v207_v3 = vld [vmem:[%s183_s4] sm:$0xff] }
  0x2d   : > { %412 = vmatprep.subr.mxu0 %v604_v0  ;;  %416 = vmatprep.mubr.msk.f32.mxu0 %vm605_vm0, %v604_v0  ;;  %v206_v4 = vld [vmem:[%s768_s1] sm:$0xff]  ;;  %vm215_vm1 = vcmask 130048   ;;  %s402_s24 = sshll.u32 %s712_s28, 3  ;;  %s405_s9 = sshll.u32 %s591_s15, 7  ;;  %vm295_vm2 = vcmask 523264  }
  0x2e   : > { %486 = vset.pattern.permute.xlu0 %v606_v1  ;;  %413 = vmatpush3.msra.mxu0 %v208_v2  ;;  %v209_v5 = vld [vmem:[%s769_s2] sm:$0xff]  ;;  %s205_s10 = scalar_lea.vmem [#allocation5], %s402_s24  ;;  %s310_s21 = scalar_lea.hbm %s770_s3, %s405_s9 }
  0x2f   : > { %414 = vmatprep.subr.mxu0 %v604_v0  ;;  %212 = vperm.xlu0 %486, %v209_v5   ;;  %s312_s11 = sshll.u32 %s205_s10, 4  ;;  %s298_s22 = scalar_lea.sflag [#allocation4], %s712_s28  ;;  %s313_s11 = int_to_ptr.vmem [resolvable:$true] %s312_s11 }
  0x30   : > { %415 = vmatpush3.msra.mxu0 %v207_v3  ;;  %s519_s23 = scalar_lea.vmem %s313_s11, 128  ;;  %s607_s29 = smov [#allocation5]  }
  0x31   : > { %417 = vmatmul.mubr.msk.f32.vlgmr.msra.gmra.mxu0 %vm215_vm1, %v206_v4  ;;  %p520_p8 = scmp.ne.s32.totalorder %s313_s11, %s519_s23  ;;  %s523_s30 = sshll.u32 %s607_s29, 4  ;;  %s524_s30 = int_to_ptr.vmem [resolvable:$false] %s523_s30 }
  0x32   : > { %s525_s15 = scalar_lea.vmem %s524_s30, 256  ;;  %p526_p1 = scmp.lt.s32.totalorder %s313_s11, %s524_s30 }
  0x33   : > { %p521_p12 = pnand %p520_p8, %p679_p9  ;;  %p527_p3 = scmp.lt.s32.totalorder %s525_s15, %s519_s23 }
  0x35   : > { %p522_p0 = pneg %p521_p12  ;;  %p528_p5 = por %p527_p3, %p526_p1 }
  0x37   : > { %p529_p6 = pnand %p528_p5, %p522_p0 }
  0xaa   : > { %v213_v6 = vpop.permute.xlu0 %212 }
  0xf1   : > { %v285_v7 = vpop.f32.mrf.mxu0 }
  0xf2   : > { %v286_v8 = vadd.f32 %v285_v7, %v213_v6 }
  0xf3   : > { %v418_v9 = vpop.f32.mrf.mxu0 }
  0xf4   : > { %v289_v10 = vsub.f32 0.0, %v286_v8 }
  0xf6   : > { %v290_v11 = vmul.f32 1.442695, %v289_v10 }
  0xf8   : > { %487 = vpow2.f32 %v290_v11 }
 0x105   : > { %v488_v12 = vpop.eup %487 }
 0x106   : > { %v292_v13 = vadd.f32 1.0, %v488_v12 }
 0x108   : > { %489 = vrcp.f32 %v292_v13 }
 0x115   : > { %v490_v14 = vpop.eup %489 }
 0x116   : > { %v294_v15 = vmul.f32 %v490_v14, %v286_v8 }
 0x118   : > { %296 = vst.msk [vmem:[%s205_s10] sm:$0xff] %vm295_vm2, %v294_v15 }
 0x119   : > { %532 = shalt.err (!%p529_p6)
}
 0x11a   : > { %s533_s4 = scalar_lea.hbm %s310_s21, 128  ;;  %s537_s6 = scalar_lea.hbm %s770_s3, 256 }
 0x11b   : > { %p534_p7 = scmp.ne.s32.totalorder %s310_s21, %s533_s4  ;;  %p538_p13 = scmp.lt.s32.totalorder %s310_s21, %s770_s3 }
 0x11c   : > { %p539_p2 = scmp.lt.s32.totalorder %s537_s6, %s533_s4 }
 0x11d   : > { %p535_p10 = pnand %p534_p7, %p679_p9 }
 0x11e   : > { %p540_p8 = por %p539_p2, %p538_p13 }
 0x11f   : > { %p536_p4 = pneg %p535_p10 }
 0x121   : > { %p541_p12 = pnand %p540_p8, %p536_p4 }
 0x123   : > { %544 = shalt.err (!%p541_p12)
}
 0x124   : > { %421 = dma.vmem_to_hbm [thread:$0]  (%p679_p9), %s313_s11, 128, %s310_s21, %s298_s22  }
 0x125 PF: > { %s324_s24 = sand.u32 1, %s579_s12   ;;  %p776_p0 = scmp.ge.s32.totalorder %s599_s17, 2 }
 0x126   : > { %s325_s9 = scalar_lea.sflag [#allocation4], %s324_s24 }
 0x127   : > { %p428_p1 = pnand %p776_p0, %p686_p11 }
 0x129   : > { %p429_p3 = pneg %p428_p1 }
 0x12b   : > { %574 = dma.done.wait (%p429_p3), %s325_s9, 128  }
 0x12c   : > { %576 = vsyncadd (%p429_p3), %s325_s9, 4294967168  ;;  %s19_s17 = sadd.s32 1, %s599_s17   ;;  %s777_s12 = smov %s583_s13 }
 0x12d   : > { %p16_p5 = scmp.ge.s32.totalorder %s19_s17, 4   ;;  %s778_s13 = smov %s587_s14 }
 0x12e   : > { %s779_s14 = smov %s684_s26  ;;  %s780_s15 = smov %s595_s16 }
 0x12f   : > { %s781_s16 = smov %s783_s20  ;;  %18 = sbr.rel (!%p16_p5) target bundleno = 6 (0x6), region = 77 }
 0x134   :  { %330 = vsyncpa [#allocation3], 1 }
 0x135   :  { %332 = vsyncpa [#allocation3 + $0x1], 1 }
 0x136   :  { %333 = vsyncpa [#allocation4], 1 }
 0x137   :  { %335 = vsyncpa [#allocation4 + $0x1], 1 }

</bundles_post_ra>
